<compile_context>
chip_gen: v7x
topology: tpu7x:2x2x1
jax: 0.10.0
libtpu: 0.0.40
codegen_flags: <defaults>
</compile_context>

<pallas_src>
import numpy as np
import jax
import jax.numpy as jnp
from jax.experimental import pallas as pl
from jax.experimental.pallas import tpu as pltpu

_LANE = 128
_SUBLANE = 8
_TILE_BYTES = 2 * 1024 * 1024        # per-buffer tile target (~2 MiB)
_VMEM_LIMIT = 32 * 1024 * 1024       # explicit scoped-VMEM budget (fits all gens)


def _recip(s):
    # EUP approx reciprocal (free-ish slot) + one Newton step -> ~f32-exact.
    inv = pl.reciprocal(s, approx=True)
    return inv * (2.0 - s * inv)


def _softmax_lane_kernel(x_ref, o_ref):
    # Block (TILE_R, n): numerically-stable softmax along the lane (last) axis.
    x = x_ref[...].astype(jnp.float32)
    m = jnp.max(x, axis=-1, keepdims=True)
    e = jnp.exp(x - m)
    s = jnp.sum(e, axis=-1, keepdims=True)
    o_ref[...] = (e * _recip(s)).astype(o_ref.dtype)


def _softmax_sublane_kernel(x_ref, o_ref):
    # Block (TILE_PRE, red, TILE_POST): softmax along the sublane (middle) axis.
    x = x_ref[...].astype(jnp.float32)
    m = jnp.max(x, axis=1, keepdims=True)
    e = jnp.exp(x - m)
    s = jnp.sum(e, axis=1, keepdims=True)
    o_ref[...] = (e * _recip(s)).astype(o_ref.dtype)


def pallas_softmax(x: jax.Array, dim: int) -> jax.Array:
    """Softmax over `dim`; hot path (max / exp / sum / div) inside Pallas."""
    dim = dim % x.ndim
    shape = x.shape
    itemsize = jnp.dtype(x.dtype).itemsize
    pre = int(np.prod(shape[:dim])) if dim > 0 else 1
    red = int(shape[dim])
    post = int(np.prod(shape[dim + 1:])) if dim < x.ndim - 1 else 1

    def _params(sem):
        return pltpu.CompilerParams(dimension_semantics=sem,
                                    vmem_limit_bytes=_VMEM_LIMIT)

    if post == 1:
        # --- Reduction axis is the last axis: reduce over lanes. ---
        r, n = pre, red
        x2d = x.reshape(r, n)
        if r <= _SUBLANE:
            tile_r = r                                        # full dim: always legal
        else:
            tile_r = min(r, max(_SUBLANE, _TILE_BYTES // (n * itemsize)))
            tile_r = max(_SUBLANE, (tile_r // _SUBLANE) * _SUBLANE)
        out = pl.pallas_call(
            _softmax_lane_kernel,
            out_shape=jax.ShapeDtypeStruct((r, n), x.dtype),
            grid=(pl.cdiv(r, tile_r),),
            in_specs=[pl.BlockSpec((tile_r, n), lambda i: (i, 0))],
            out_specs=pl.BlockSpec((tile_r, n), lambda i: (i, 0)),
            compiler_params=_params(("parallel",)),
        )(x2d)
        return out.reshape(shape)

    # --- Reduction axis is NOT last: keep trailing dims on lanes, reduce over
    # the sublane axis. No transposes; lane-dense loads/stores. ---
    x3d = x.reshape(pre, red, post)
    if post % _LANE == 0:
        lane_cap = max(_LANE, (_TILE_BYTES // (red * itemsize)) // _LANE * _LANE)
        tile_post = min(post, lane_cap)
    else:
        tile_post = post                                       # full dim: always legal
    tile_pre = max(1, min(pre, _TILE_BYTES // max(red * tile_post * itemsize, 1)))

    out = pl.pallas_call(
        _softmax_sublane_kernel,
        out_shape=jax.ShapeDtypeStruct((pre, red, post), x.dtype),
        grid=(pl.cdiv(pre, tile_pre), pl.cdiv(post, tile_post)),
        in_specs=[pl.BlockSpec((tile_pre, red, tile_post),
                               lambda i, j: (i, 0, j))],
        out_specs=pl.BlockSpec((tile_pre, red, tile_post),
                               lambda i, j: (i, 0, j)),
        compiler_params=_params(("parallel", "parallel")),
    )(x3d)
    return out.reshape(shape)


def reference_softmax(x: jax.Array, dim: int) -> jax.Array:
    return jax.nn.softmax(x, axis=dim)


if __name__ == "__main__":
    # Mirror the module's __init__: deterministic "random" choice of the axis.
    np.random.seed(0)
    module_dim = int(np.random.randint(0, 3))

    # Small 3-D input (B, C, L) consistent with dim in {0, 1, 2}.
    key = jax.random.PRNGKey(0)
    x = jax.random.normal(key, (2, 4, 32), dtype=jnp.float32)

    # Run the module-selected axis once and block on it.
    out = jax.block_until_ready(pallas_softmax(x, module_dim))
    np.testing.assert_allclose(np.asarray(out),
                               np.asarray(reference_softmax(x, module_dim)),
                               rtol=1e-5, atol=1e-6)

    # Since the module's dim is random at __init__, also validate every axis
    # (exercises both the lane-reduce and sublane-reduce kernels).
    for d in range(3):
        o = jax.block_until_ready(pallas_softmax(x, d))
        np.testing.assert_allclose(np.asarray(o),
                                   np.asarray(reference_softmax(x, d)),
                                   rtol=1e-5, atol=1e-6)
        sums = np.asarray(jnp.sum(o, axis=d))
        np.testing.assert_allclose(sums, np.ones_like(sums), rtol=1e-5, atol=1e-5)

    print("KERNEL_OK")
</pallas_src>

<mosaic_0001>
module attributes {stable_mosaic.version = 11 : i64} {
  func.func @_softmax_sublane_kernel(%arg0: i32, %arg1: i32, %arg2: memref<1x2x128xf32, #tpu.memory_space<vmem>>, %arg3: memref<1x2x128xf32, #tpu.memory_space<vmem>>) attributes {dimension_semantics = [#tpu.dimension_semantics<parallel>, #tpu.dimension_semantics<parallel>], iteration_bounds = array<i64: 1, 1>, scalar_prefetch = 0 : i64, scratch_operands = 0 : i64, tpu.core_type = #tpu.core_type<tc>, window_params = [{transform_indices = @transform_0, window_bounds = array<i64: 1, 2, 128>}, {transform_indices = @transform_1, window_bounds = array<i64: 1, 2, 128>}]} {
    %c0 = arith.constant 0 : index
    %c0_0 = arith.constant 0 : index
    %c0_1 = arith.constant 0 : index
    %0 = vector.load %arg2[%c0, %c0_0, %c0_1] : memref<1x2x128xf32, #tpu.memory_space<vmem>>, vector<1x2x128xf32>
    %cst = arith.constant dense<0xFF800000> : vector<1x128xf32>
    %1 = vector.multi_reduction <maximumf>, %0, %cst [1] : vector<1x2x128xf32> to vector<1x128xf32>
    %2 = vector.shape_cast %1 : vector<1x128xf32> to vector<1x1x128xf32>
    %3 = vector.broadcast %2 : vector<1x1x128xf32> to vector<1x2x128xf32>
    %4 = arith.subf %0, %3 : vector<1x2x128xf32>
    %5 = math.exp %4 : vector<1x2x128xf32>
    %cst_2 = arith.constant dense<0.000000e+00> : vector<1x128xf32>
    %6 = vector.multi_reduction <add>, %5, %cst_2 [1] : vector<1x2x128xf32> to vector<1x128xf32>
    %7 = vector.shape_cast %6 : vector<1x128xf32> to vector<1x1x128xf32>
    %8 = tpu.reciprocal %7 {approx = true} : vector<1x1x128xf32> -> vector<1x1x128xf32>
    %9 = arith.mulf %7, %8 : vector<1x1x128xf32>
    %cst_3 = arith.constant 2.000000e+00 : f32
    %10 = vector.broadcast %cst_3 : f32 to vector<1x1x128xf32>
    %11 = arith.subf %10, %9 : vector<1x1x128xf32>
    %12 = arith.mulf %8, %11 : vector<1x1x128xf32>
    %13 = vector.broadcast %12 : vector<1x1x128xf32> to vector<1x2x128xf32>
    %14 = arith.mulf %5, %13 : vector<1x2x128xf32>
    %c0_4 = arith.constant 0 : index
    %c0_5 = arith.constant 0 : index
    %c0_6 = arith.constant 0 : index
    %15 = vector.load %arg3[%c0_4, %c0_5, %c0_6] : memref<1x2x128xf32, #tpu.memory_space<vmem>>, vector<1x2x128xf32>
    tpu.vector_store %arg3[%c0_4, %c0_5, %c0_6], %14 {strides = array<i32>} : memref<1x2x128xf32, #tpu.memory_space<vmem>>, vector<1x2x128xf32>,
    return
  }
  func.func @transform_0(%arg0: i32, %arg1: i32) -> (i32, i32, i32) {
    %c0_i32 = arith.constant 0 : i32
    %c0_i32_0 = arith.constant 0 : i32
    return %arg0, %c0_i32, %arg1 : i32, i32, i32
  }
  func.func @transform_1(%arg0: i32, %arg1: i32) -> (i32, i32, i32) {
    %c0_i32 = arith.constant 0 : i32
    %c0_i32_0 = arith.constant 0 : i32
    return %arg0, %c0_i32, %arg1 : i32, i32, i32
  }
}

</mosaic_0001>

<bundles_post_ra>
// kernel: tpu_custom_call.1
= control target key start
LH: loop header
LB: loop body
LE: loop exit
PB: predicated region body
PF: predicated region fallthrough
CT: control target
= control target key end

     0   :  { %6 = vsyncpa [#allocation3], 0  ;;  %s151_s0 = inlined_call_operand.hbm [shape: f32[1,2,128], index: 0, kind: input, shape index: {}]   ;;  %s152_s1 = inlined_call_operand.hbm [shape: f32[1,2,128], index: 1, kind: output, shape index: {}]  }
   0x1   :  { %7 = vsyncpa [#allocation4], 0  ;;  %s115_s6 = smov [#allocation2]   ;;  %s67_s10 = scalar_lea.hbm %s151_s0, 32 }
   0x2   :  { %s14_s7 = sshll.u32 %s115_s6, 4  ;;  %p68_p0 = scmp.ne.s32.totalorder %s151_s0, %s67_s10  ;;  %s15_s7 = int_to_ptr.vmem [resolvable:$true] %s14_s7 }
   0x3   :  { %p71_p1 = scmp.lt.u32.totalorder %s67_s10, %s151_s0 }
   0x5   :  { %p73_p2 = pnand %p71_p1, %p68_p0 }
   0x7   :  { %76 = shalt.err (!%p73_p2)
}
   0x8   :  { %s77_s15 = scalar_lea.vmem %s15_s7, 32  ;;  %p82_p4 = scmp.lt.s32.totalorder %s15_s7, %s15_s7 }
   0x9   :  { %p78_p3 = scmp.ne.s32.totalorder %s15_s7, %s77_s15  ;;  %p83_p5 = scmp.lt.s32.totalorder %s77_s15, %s77_s15 }
   0xb   :  { %p84_p6 = por %p83_p5, %p82_p4 }
   0xd   :  { %p85_p7 = pnand %p84_p6, %p78_p3 }
   0xf   :  { %88 = shalt.err (!%p85_p7)
}
  0x10   :  { %17 = dma.hbm_to_vmem [thread:$0]  %s151_s0, 32, %s15_s7, [#allocation3]  }
  0x11   :  { %111 = dma.done.wait [#allocation3], 32  }
  0x12   :  { %112 = vsyncadd [#allocation3], 4294967264  ;;  %vm22_vm0 = vcmask 1041408   ;;  %v21_v0 = vld [vmem:[#allocation2] sm:$0x3]  ;;  %s116_s0 = smov [#allocation5]  }
  0x13   :  { %v23_v1 = vsel %vm22_vm0, %v21_v0, -inf  ;;  %s52_s18 = sshll.u32 %s116_s0, 4  ;;  %s53_s18 = int_to_ptr.vmem [resolvable:$true] %s52_s18 }
  0x14   :  { %v24_v2 = vrot.slane %v23_v1, 4  ;;  %s89_s19 = scalar_lea.vmem %s53_s18, 32  ;;  %p94_p9 = scmp.lt.s32.totalorder %s53_s18, %s53_s18 }
  0x15   :  { %p90_p8 = scmp.ne.s32.totalorder %s53_s18, %s89_s19  ;;  %p95_p10 = scmp.lt.s32.totalorder %s89_s19, %s89_s19 }
  0x16   :  { %v25_v3 = vmax.f32 %v23_v1, %v24_v2 }
  0x17   :  { %p96_p11 = por %p95_p10, %p94_p9 }
  0x18   :  { %v26_v4 = vrot.slane %v25_v3, 2 }
  0x19   :  { %p97_p12 = pnand %p96_p11, %p90_p8 }
  0x1a   :  { %v27_v5 = vmax.f32 %v25_v3, %v26_v4 }
  0x1c   :  { %v28_v6 = vrot.slane %v27_v5, 1 }
  0x1e   :  { %v29_v7 = vmax.f32 %v27_v5, %v28_v6 }
  0x20   :  { %v30_v8 = vsub.f32 %v21_v0, %v29_v7 }
  0x22   :  { %v31_v9 = vmul.f32 1.442695, %v30_v8 }
  0x24   :  { %63 = vpow2.f32 %v31_v9 }
  0x2e   :  { %v64_v10 = vpop.eup %63 }
  0x2f   :  { %v33_v11 = vsel %vm22_vm0, %v64_v10, 0.0 }
  0x30   :  { %v34_v12 = vrot.slane %v33_v11, 4 }
  0x32   :  { %v35_v13 = vadd.f32 %v34_v12, %v33_v11 }
  0x34   :  { %v36_v14 = vrot.slane %v35_v13, 2 }
  0x36   :  { %v37_v15 = vadd.f32 %v36_v14, %v35_v13 }
  0x38   :  { %v38_v16 = vrot.slane %v37_v15, 1 }
  0x3a   :  { %v39_v17 = vadd.f32 %v38_v16, %v37_v15 }
  0x3c   :  { %65 = vrcp.f32 %v39_v17 }
  0x46   :  { %v66_v18 = vpop.eup %65 }
  0x47   :  { %v41_v19 = vmul.f32 %v66_v18, %v39_v17 }
  0x49   :  { %v42_v20 = vsub.f32 2.0, %v41_v19 }
  0x4b   :  { %v43_v21 = vmul.f32 %v66_v18, %v42_v20 }
  0x4d   :  { %v44_v22 = vmul.f32 %v64_v10, %v43_v21 }
  0x4f   :  { %45 = vst [vmem:[#allocation5] sm:$0x3] %v44_v22 }
  0x50   :  { %100 = shalt.err (!%p97_p12)
}
  0x51   :  { %s101_s22 = scalar_lea.hbm %s152_s1, 32 }
  0x52   :  { %p102_p13 = scmp.ne.s32.totalorder %s152_s1, %s101_s22  ;;  %p105_p0 = scmp.lt.u32.totalorder %s101_s22, %s152_s1 }
  0x54   :  { %p107_p1 = pnand %p105_p0, %p102_p13 }
  0x56   :  { %110 = shalt.err (!%p107_p1)
}
  0x57   :  { %55 = dma.vmem_to_hbm [thread:$0]  %s53_s18, 32, %s152_s1, [#allocation4]  }
  0x58   :  { %113 = dma.done.wait [#allocation4], 32  }
  0x59   :  { %114 = vsyncadd [#allocation4], 4294967264 }
  0x5a   :  { %59 = vsyncpa [#allocation3], 1 }
  0x5b   :  { %60 = vsyncpa [#allocation4], 1 }

</bundles_post_ra>
